<compile_context>
chip_gen: v7x
topology: tpu7x:2x2x1
jax: 0.10.0
libtpu: 0.0.40
codegen_flags: <defaults>
</compile_context>

<pallas_src>
import jax
import jax.numpy as jnp
from jax.experimental import pallas as pl
from jax.experimental.pallas import tpu as pltpu


def _round_up(n, m):
    return ((n + m - 1) // m) * m


def _mlp_kernel(x_ref, w1_ref, b1_ref, w2_ref, b2_ref, w3_ref, b3_ref, out_ref):
    # fc1 + ReLU (f32 MXU accumulate, f32 VPU epilogue)
    h = jnp.dot(x_ref[...], w1_ref[...], preferred_element_type=jnp.float32)
    h = jnp.maximum(h + b1_ref[...], 0.0)
    # fc2 + ReLU
    h = jnp.dot(h, w2_ref[...], preferred_element_type=jnp.float32)
    h = jnp.maximum(h + b2_ref[...], 0.0)
    # fc3 (no activation)
    h = jnp.dot(h, w3_ref[...], preferred_element_type=jnp.float32)
    out_ref[...] = (h + b3_ref[...]).astype(out_ref.dtype)


def nn_forward(x, w1, b1, w2, b2, w3, b3, *, block_b=4096):
    """Fused forward pass of the NN module.

    x : [B, input_size1] float32
    w1: [input_size1, hidden], b1: [hidden]
    w2: [hidden, hidden],      b2: [hidden]
    w3: [hidden, output],      b3: [output]
    returns [B, output] float32
    """
    B, in_f = x.shape
    hidden = w1.shape[1]
    out_f = w3.shape[1]

    x = x.astype(jnp.float32)
    w1 = w1.astype(jnp.float32)
    w2 = w2.astype(jnp.float32)
    w3 = w3.astype(jnp.float32)

    # Biases as [1, F] rows (clean (sublane, lane) layout; broadcast over batch).
    b1r = b1.astype(jnp.float32).reshape(1, hidden)
    b2r = b2.astype(jnp.float32).reshape(1, hidden)
    b3r = b3.astype(jnp.float32).reshape(1, out_f)

    # Batch tile: multiple of 8 rows (f32 sublane minimum), capped for small B.
    tb = _round_up(min(block_b, _round_up(B, 8)), 8)
    grid = (pl.cdiv(B, tb),)  # ragged last block: masked writeback, no jnp.pad copy

    def _const_spec(shape):
        return pl.BlockSpec(shape, lambda i: tuple(0 for _ in shape))

    flops = 2 * B * (in_f * hidden + hidden * hidden + hidden * out_f)
    bytes_accessed = (
        B * in_f * 4                                     # x in (f32)
        + (w1.size + w2.size + w3.size) * 4              # weights (f32, loaded once)
        + (b1r.size + b2r.size + b3r.size) * 4           # biases (f32)
        + B * out_f * 4                                  # output (f32, unpadded)
    )

    out = pl.pallas_call(
        _mlp_kernel,
        out_shape=jax.ShapeDtypeStruct((B, out_f), jnp.float32),
        grid=grid,
        in_specs=[
            pl.BlockSpec((tb, in_f), lambda i: (i, 0)),   # x: tiled over batch
            _const_spec(w1.shape), _const_spec(b1r.shape),
            _const_spec(w2.shape), _const_spec(b2r.shape),
            _const_spec(w3.shape), _const_spec(b3r.shape),
        ],
        out_specs=pl.BlockSpec((tb, out_f), lambda i: (i, 0)),
        compiler_params=pltpu.CompilerParams(
            # Batch axis is independent per tile -> shards across the 2 TCs on v7x.
            # TODO(synk): if xprof shows one v7x core idle, switch to an explicit
            # leading core axis with pltpu.CORE_PARALLEL.
            dimension_semantics=("parallel",),
            # Headroom above v5e's 16 MiB scoped default; within physical VMEM
            # on v5e/v6e (128 MiB) and v7x (64 MiB).
            vmem_limit_bytes=32 * 1024 * 1024,
        ),
        cost_estimate=pl.CostEstimate(
            flops=int(flops), transcendentals=0,
            bytes_accessed=int(bytes_accessed)),
    )(x, w1, b1r, w2, b2r, w3, b3r)

    return out


def init_params(key, input_size1, hidden_size, output_size):
    """Deterministic init mimicking nn.Linear's U(-1/sqrt(fan_in), 1/sqrt(fan_in))."""
    ks = jax.random.split(key, 6)

    def linear(kw, kb, fan_in, fan_out):
        bound = 1.0 / jnp.sqrt(jnp.float32(fan_in))
        w = jax.random.uniform(kw, (fan_in, fan_out), jnp.float32, -bound, bound)
        b = jax.random.uniform(kb, (fan_out,), jnp.float32, -bound, bound)
        return w, b

    w1, b1 = linear(ks[0], ks[1], input_size1, hidden_size)
    w2, b2 = linear(ks[2], ks[3], hidden_size, hidden_size)
    w3, b3 = linear(ks[4], ks[5], hidden_size, output_size)
    return w1, b1, w2, b2, w3, b3


if __name__ == "__main__":
    key = jax.random.PRNGKey(0)
    k_in, k_par = jax.random.split(key)

    batch = 8
    input_size1 = 16
    hidden_size = 32
    output_size = 8

    x = jax.random.normal(k_in, (batch, input_size1), jnp.float32)
    w1, b1, w2, b2, w3, b3 = init_params(k_par, input_size1, hidden_size, output_size)

    out = nn_forward(x, w1, b1, w2, b2, w3, b3)
    out = jax.block_until_ready(out)

    # Pure-JAX f32 reference mirroring the PyTorch module's forward pass.
    h = jnp.maximum(x @ w1 + b1, 0.0)
    h = jnp.maximum(h @ w2 + b2, 0.0)
    ref = h @ w3 + b3

    assert out.shape == (batch, output_size)
    assert jnp.allclose(out, ref, atol=1e-2, rtol=1e-2), (
        jnp.max(jnp.abs(out - ref)))

    print("KERNEL_OK")
</pallas_src>

<mosaic_0001>
module attributes {stable_mosaic.version = 11 : i64} {
  func.func @_mlp_kernel(%arg0: i32, %arg1: memref<8x16xf32, #tpu.memory_space<vmem>>, %arg2: memref<16x32xf32, #tpu.memory_space<vmem>>, %arg3: memref<1x32xf32, #tpu.memory_space<vmem>>, %arg4: memref<32x32xf32, #tpu.memory_space<vmem>>, %arg5: memref<1x32xf32, #tpu.memory_space<vmem>>, %arg6: memref<32x8xf32, #tpu.memory_space<vmem>>, %arg7: memref<1x8xf32, #tpu.memory_space<vmem>>, %arg8: memref<8x8xf32, #tpu.memory_space<vmem>>) attributes {dimension_semantics = [#tpu.dimension_semantics<parallel>], iteration_bounds = array<i64: 1>, scalar_prefetch = 0 : i64, scratch_operands = 0 : i64, tpu.core_type = #tpu.core_type<tc>, window_params = [{transform_indices = @transform_0, window_bounds = array<i64: 8, 16>}, {pipeline_mode = #tpu.pipeline_mode<synchronous>, transform_indices = @transform_1, window_bounds = array<i64: 16, 32>}, {pipeline_mode = #tpu.pipeline_mode<synchronous>, transform_indices = @transform_2, window_bounds = array<i64: 1, 32>}, {pipeline_mode = #tpu.pipeline_mode<synchronous>, transform_indices = @transform_3, window_bounds = array<i64: 32, 32>}, {pipeline_mode = #tpu.pipeline_mode<synchronous>, transform_indices = @transform_4, window_bounds = array<i64: 1, 32>}, {pipeline_mode = #tpu.pipeline_mode<synchronous>, transform_indices = @transform_5, window_bounds = array<i64: 32, 8>}, {pipeline_mode = #tpu.pipeline_mode<synchronous>, transform_indices = @transform_6, window_bounds = array<i64: 1, 8>}, {transform_indices = @transform_7, window_bounds = array<i64: 8, 8>}]} {
    %c0 = arith.constant 0 : index
    %c0_0 = arith.constant 0 : index
    %0 = vector.load %arg1[%c0, %c0_0] : memref<8x16xf32, #tpu.memory_space<vmem>>, vector<8x16xf32>
    %c0_1 = arith.constant 0 : index
    %c0_2 = arith.constant 0 : index
    %1 = vector.load %arg2[%c0_1, %c0_2] : memref<16x32xf32, #tpu.memory_space<vmem>>, vector<16x32xf32>
    %cst = arith.constant dense<0.000000e+00> : vector<8x32xf32>
    %2 = tpu.matmul %0, %1, %cst {dimension_numbers = #tpu.dot_dimension_numbers<[1], [0], [0], [1], [0, 0, 1, 1], [], []>} : vector<8x16xf32>, vector<16x32xf32>, vector<8x32xf32> -> vector<8x32xf32>
    %c0_3 = arith.constant 0 : index
    %c0_4 = arith.constant 0 : index
    %3 = vector.load %arg3[%c0_3, %c0_4] : memref<1x32xf32, #tpu.memory_space<vmem>>, vector<1x32xf32>
    %4 = vector.broadcast %3 : vector<1x32xf32> to vector<8x32xf32>
    %5 = arith.addf %2, %4 : vector<8x32xf32>
    %cst_5 = arith.constant 0.000000e+00 : f32
    %6 = vector.broadcast %cst_5 : f32 to vector<8x32xf32>
    %7 = arith.maximumf %5, %6 : vector<8x32xf32>
    %c0_6 = arith.constant 0 : index
    %c0_7 = arith.constant 0 : index
    %8 = vector.load %arg4[%c0_6, %c0_7] : memref<32x32xf32, #tpu.memory_space<vmem>>, vector<32x32xf32>
    %cst_8 = arith.constant dense<0.000000e+00> : vector<8x32xf32>
    %9 = tpu.matmul %7, %8, %cst_8 {dimension_numbers = #tpu.dot_dimension_numbers<[1], [0], [0], [1], [0, 0, 1, 1], [], []>} : vector<8x32xf32>, vector<32x32xf32>, vector<8x32xf32> -> vector<8x32xf32>
    %c0_9 = arith.constant 0 : index
    %c0_10 = arith.constant 0 : index
    %10 = vector.load %arg5[%c0_9, %c0_10] : memref<1x32xf32, #tpu.memory_space<vmem>>, vector<1x32xf32>
    %11 = vector.broadcast %10 : vector<1x32xf32> to vector<8x32xf32>
    %12 = arith.addf %9, %11 : vector<8x32xf32>
    %cst_11 = arith.constant 0.000000e+00 : f32
    %13 = vector.broadcast %cst_11 : f32 to vector<8x32xf32>
    %14 = arith.maximumf %12, %13 : vector<8x32xf32>
    %c0_12 = arith.constant 0 : index
    %c0_13 = arith.constant 0 : index
    %15 = vector.load %arg6[%c0_12, %c0_13] : memref<32x8xf32, #tpu.memory_space<vmem>>, vector<32x8xf32>
    %cst_14 = arith.constant dense<0.000000e+00> : vector<8x8xf32>
    %16 = tpu.matmul %14, %15, %cst_14 {dimension_numbers = #tpu.dot_dimension_numbers<[1], [0], [0], [1], [0, 0, 1, 1], [], []>} : vector<8x32xf32>, vector<32x8xf32>, vector<8x8xf32> -> vector<8x8xf32>
    %c0_15 = arith.constant 0 : index
    %c0_16 = arith.constant 0 : index
    %17 = vector.load %arg7[%c0_15, %c0_16] : memref<1x8xf32, #tpu.memory_space<vmem>>, vector<1x8xf32>
    %18 = vector.broadcast %17 : vector<1x8xf32> to vector<8x8xf32>
    %19 = arith.addf %16, %18 : vector<8x8xf32>
    %c0_17 = arith.constant 0 : index
    %c0_18 = arith.constant 0 : index
    %20 = vector.load %arg8[%c0_17, %c0_18] : memref<8x8xf32, #tpu.memory_space<vmem>>, vector<8x8xf32>
    tpu.vector_store %arg8[%c0_17, %c0_18], %19 {strides = array<i32>} : memref<8x8xf32, #tpu.memory_space<vmem>>, vector<8x8xf32>,
    return
  }
  func.func @transform_0(%arg0: i32) -> (i32, i32) {
    %c0_i32 = arith.constant 0 : i32
    %c0_i32_0 = arith.constant 0 : i32
    return %arg0, %c0_i32 : i32, i32
  }
  func.func @transform_1(%arg0: i32) -> (i32, i32) {
    %c0_i32 = arith.constant 0 : i32
    %c0_i32_0 = arith.constant 0 : i32
    %c0_i32_1 = arith.constant 0 : i32
    return %c0_i32, %c0_i32_0 : i32, i32
  }
  func.func @transform_2(%arg0: i32) -> (i32, i32) {
    %c0_i32 = arith.constant 0 : i32
    %c0_i32_0 = arith.constant 0 : i32
    %c0_i32_1 = arith.constant 0 : i32
    return %c0_i32, %c0_i32_0 : i32, i32
  }
  func.func @transform_3(%arg0: i32) -> (i32, i32) {
    %c0_i32 = arith.constant 0 : i32
    %c0_i32_0 = arith.constant 0 : i32
    %c0_i32_1 = arith.constant 0 : i32
    return %c0_i32, %c0_i32_0 : i32, i32
  }
  func.func @transform_4(%arg0: i32) -> (i32, i32) {
    %c0_i32 = arith.constant 0 : i32
    %c0_i32_0 = arith.constant 0 : i32
    %c0_i32_1 = arith.constant 0 : i32
    return %c0_i32, %c0_i32_0 : i32, i32
  }
  func.func @transform_5(%arg0: i32) -> (i32, i32) {
    %c0_i32 = arith.constant 0 : i32
    %c0_i32_0 = arith.constant 0 : i32
    %c0_i32_1 = arith.constant 0 : i32
    return %c0_i32, %c0_i32_0 : i32, i32
  }
  func.func @transform_6(%arg0: i32) -> (i32, i32) {
    %c0_i32 = arith.constant 0 : i32
    %c0_i32_0 = arith.constant 0 : i32
    %c0_i32_1 = arith.constant 0 : i32
    return %c0_i32, %c0_i32_0 : i32, i32
  }
  func.func @transform_7(%arg0: i32) -> (i32, i32) {
    %c0_i32 = arith.constant 0 : i32
    %c0_i32_0 = arith.constant 0 : i32
    return %arg0, %c0_i32 : i32, i32
  }
}

</mosaic_0001>

<bundles_post_ra>
// kernel: tpu_custom_call.1
= control target key start
LH: loop header
LB: loop body
LE: loop exit
PB: predicated region body
PF: predicated region fallthrough
CT: control target
= control target key end

     0   :  { %12 = vsyncpa [#allocation3], 0  ;;  %s538_s0 = inlined_call_operand.hbm [shape: f32[8,16], index: 0, kind: input, shape index: {}]   ;;  %s539_s1 = inlined_call_operand.vmem [shape: f32[16,32], index: 1, kind: input, shape index: {}]   ;;  %s540_s2 = inlined_call_operand.vmem [shape: f32[1,32], index: 2, kind: input, shape index: {}]   ;;  %s541_s3 = inlined_call_operand.vmem [shape: f32[32,32], index: 3, kind: input, shape index: {}]   ;;  %s542_s4 = inlined_call_operand.vmem [shape: f32[1,32], index: 4, kind: input, shape index: {}]   ;;  %s543_s5 = inlined_call_operand.vmem [shape: f32[32,8], index: 5, kind: input, shape index: {}]   ;;  %s544_s6 = inlined_call_operand.vmem [shape: f32[1,8], index: 6, kind: input, shape index: {}]   ;;  %s545_s7 = inlined_call_operand.hbm [shape: f32[8,8], index: 7, kind: output, shape index: {}]  }
   0x1   :  { %13 = vsyncpa [#allocation4], 0  ;;  %s427_s24 = smov [#allocation2]   ;;  %s379_s28 = scalar_lea.hbm %s538_s0, 128 }
   0x2   :  { %s20_s25 = sshll.u32 %s427_s24, 4  ;;  %p380_p0 = scmp.ne.s32.totalorder %s538_s0, %s379_s28  ;;  %s21_s25 = int_to_ptr.vmem [resolvable:$true] %s20_s25 }
   0x3   :  { %p383_p1 = scmp.lt.u32.totalorder %s379_s28, %s538_s0 }
   0x5   :  { %p385_p2 = pnand %p383_p1, %p380_p0 }
   0x7   :  { %388 = shalt.err (!%p385_p2)
}
   0x8   :  { %s389_s10 = scalar_lea.vmem %s21_s25, 128  ;;  %p394_p4 = scmp.lt.s32.totalorder %s21_s25, %s21_s25 }
   0x9   :  { %p390_p3 = scmp.ne.s32.totalorder %s21_s25, %s389_s10  ;;  %p395_p5 = scmp.lt.s32.totalorder %s389_s10, %s389_s10 }
   0xb   :  { %p396_p6 = por %p395_p5, %p394_p4 }
   0xd   :  { %p397_p7 = pnand %p396_p6, %p390_p3 }
   0xf   :  { %400 = shalt.err (!%p397_p7)
}
  0x10   :  { %23 = dma.hbm_to_vmem [thread:$0]  %s538_s0, 128, %s21_s25, [#allocation3]  }
  0x11   :  { %423 = dma.done.wait [#allocation3], 128  }
  0x12   :  { %424 = vsyncadd [#allocation3], 4294967168  ;;  %v428_v0 = vmov 0.0|0.0   ;;  %vm429_vm0 = vmmov 0   ;;  %v430_v1 = vmov 0.0   ;;  %v40_v2 = vld [vmem:[%s539_s1] sm:$0xff] }
  0x13   :  { %359 = vmatprep.subr.bf16.mxu0 %v428_v0  ;;  %334 = vmatprep.mubr.msk.f32.mxu0 %vm429_vm0, %v430_v1  ;;  %v41_v3 = vld [vmem:[%s539_s1 + $0x8] sm:$0xff]  ;;  %v124_v5 = vld [vmem:[%s541_s3] sm:$0xff]  ;;  %vm49_vm1 = vcmask 130048   ;;  %v126_v9 = vld [vmem:[%s541_s3 + $0x10] sm:$0xff]  ;;  %vm135_vm2 = vcmask 261120   ;;  %s431_s12 = smov [#allocation5]  }
  0x14   :  { %362 = vmatprep.subr.bf16.mxu1 %v428_v0  ;;  %345 = vmatprep.mubr.msk.f32.mxu1 %vm429_vm0, %v430_v1  ;;  %v360_v4 = vpack.c.bf16 %v41_v3, %v40_v2  ;;  %v125_v6 = vld [vmem:[%s541_s3 + $0x8] sm:$0xff]  ;;  %v39_v8 = vld [vmem:[#allocation2] sm:$0xff]  ;;  %v127_v10 = vld [vmem:[%s541_s3 + $0x18] sm:$0xff]  ;;  %s302_s13 = sshll.u32 %s431_s12, 4  ;;  %vm294_vm3 = vcmask 64512   ;;  %s303_s13 = int_to_ptr.vmem [resolvable:$true] %s302_s13 }
  0x15   :  { %v363_v7 = vpack.c.bf16 %v125_v6, %v124_v5  ;;  %v366_v11 = vpack.c.bf16 %v127_v10, %v126_v9  ;;  %v210_v12 = vld [vmem:[%s543_s5] sm:$0xff]  ;;  %v211_v13 = vld [vmem:[%s543_s5 + $0x8] sm:$0xff]  ;;  %v212_v20 = vld [vmem:[%s543_s5 + $0x10] sm:$0xff]  ;;  %p406_p9 = scmp.lt.s32.totalorder %s303_s13, %s303_s13 }
  0x16   :  { %361 = vmatpush3.bf16.msra.mxu0 %v360_v4  ;;  %v369_v14 = vpack.c.bf16 %v211_v13, %v210_v12  ;;  %v311_v15 = vld [vmem:[%s540_s2] ss:$0 sm:$0xff]  ;;  %v213_v21 = vld [vmem:[%s543_s5 + $0x18] sm:$0xff]  ;;  %s401_s5 = scalar_lea.vmem %s303_s13, 128 }
  0x17   :  { %364 = vmatpush3.bf16.msra.mxu1 %v363_v7  ;;  %368 = vmatprep.subr.bf16.mxu0 %v428_v0  ;;  %v372_v22 = vpack.c.bf16 %v213_v21, %v212_v20  ;;  %v313_v23 = vld [vmem:[%s542_s4] ss:$0 sm:$0xff]  ;;  %p402_p8 = scmp.ne.s32.totalorder %s303_s13, %s401_s5  ;;  %p407_p10 = scmp.lt.s32.totalorder %s401_s5, %s401_s5 }
  0x18   :  { %365 = vmatprep.subr.bf16.mxu1 %v428_v0  ;;  %v315_v28 = vld [vmem:[%s544_s6] ss:$0 sm:$0xff] }
  0x19   :  { %335 = vmatmul.mubr.msk.f32.vlgmr.msra.gmra.mrb[0].mxu0 %vm49_vm1, %v39_v8  ;;  %p408_p11 = por %p407_p10, %p406_p9 }
  0x1a   :  { %356 = vmatprep.mubr.msk.f32.mxu0 %vm429_vm0, %v430_v1  ;;  %370 = vmatpush3.bf16.msra.mxu0 %v369_v14 }
  0x1b   :  { %367 = vmatpush3.bf16.msra.mxu1 %v366_v11  ;;  %371 = vmatprep.subr.bf16.mxu0 %v428_v0  ;;  %p409_p12 = pnand %p408_p11, %p402_p8 }
  0x1e   :  { %373 = vmatpush3.bf16.msra.mxu0 %v372_v22 }
  0xec   :  { %v119_v16 = vpop.f32.mrb[0].mxu0 }
  0xed   :  { %v120_v17 = vadd.f32 %v311_v15, %v119_v16  ;;  %v336_v18 = vpop.f32.mrb[1].mxu0 }
  0xef   :  { %v123_v19 = vmax.f32 %v120_v17, 0.0 }
  0xf1   :  { %346 = vmatmul.mubr.msk.f32.vlgmr.msra.gmra.mrb[0].mxu1 %vm135_vm2, %v123_v19 }
 0x1c4   :  { %v205_v24 = vpop.f32.mrb[0].mxu1 }
 0x1c5   :  { %v206_v25 = vadd.f32 %v313_v23, %v205_v24  ;;  %v347_v26 = vpop.f32.mrb[1].mxu1 }
 0x1c7   :  { %v209_v27 = vmax.f32 %v206_v25, 0.0 }
 0x1c9   :  { %357 = vmatmul.mubr.msk.f32.vlgmr.msra.gmra.mrb[2].mxu0 %vm135_vm2, %v209_v27 }
 0x29c   :  { %v290_v29 = vpop.f32.mrb[2].mxu0 }
 0x29d   :  { %v291_v30 = vadd.f32 %v315_v28, %v290_v29  ;;  %v358_v31 = vpop.f32.mrb[3].mxu0 }
 0x29f   :  { %295 = vst.msk [vmem:[#allocation5] sm:$0xff] %vm294_vm3, %v291_v30 }
 0x2a0   :  { %412 = shalt.err (!%p409_p12)
}
 0x2a1   :  { %s413_s15 = scalar_lea.hbm %s545_s7, 128 }
 0x2a2   :  { %p414_p13 = scmp.ne.s32.totalorder %s545_s7, %s413_s15  ;;  %p417_p0 = scmp.lt.u32.totalorder %s413_s15, %s545_s7 }
 0x2a4   :  { %p419_p1 = pnand %p417_p0, %p414_p13 }
 0x2a6   :  { %422 = shalt.err (!%p419_p1)
}
 0x2a7   :  { %305 = dma.vmem_to_hbm [thread:$0]  %s303_s13, 128, %s545_s7, [#allocation4]  }
 0x2a8   :  { %425 = dma.done.wait [#allocation4], 128  }
 0x2a9   :  { %426 = vsyncadd [#allocation4], 4294967168 }
 0x2aa   :  { %309 = vsyncpa [#allocation3], 1 }
 0x2ab   :  { %310 = vsyncpa [#allocation4], 1 }

</bundles_post_ra>
